<compile_context>
chip_gen: v7x
topology: tpu7x:2x2x1
jax: 0.10.0
libtpu: 0.0.40
codegen_flags: <defaults>
</compile_context>

<pallas_src>
import functools

import jax
import jax.numpy as jnp
from jax.experimental import pallas as pl
from jax.experimental.pallas import tpu as pltpu


def _infonce_kernel(x1i_ref, x1j_ref, x2j_ref, out_ref,
                    lhs_ref, pdiag_ref, m_acc, l_acc, *, inv_t, eps):
    j = pl.program_id(0)              # column block (parallel)
    i = pl.program_id(1)              # streamed row block (arbitrary)
    num_i = pl.num_programs(1)
    ti = x1i_ref.shape[0]
    tj = x1j_ref.shape[0]

    # ---- Per-column-block work, hoisted out of the row loop (once per j). ----
    @pl.when(i == 0)
    def _init():
        x1j = x1j_ref[...]
        x1j_f32 = x1j.astype(jnp.float32)
        x2j_f32 = x2j_ref[...].astype(jnp.float32)
        sq1 = x1j_f32 * x1j_f32
        sq2 = x2j_f32 * x2j_f32
        pr12 = x1j_f32 * x2j_f32

        # (Tj, 1) squared norm: fold 1/(T * max(||x1_j||^2, eps)) into the
        # matmul operand; keep the operand in its native dtype for the MXU.
        # (Optional: cast f32 inputs to bf16 here for MXU speed -- skipped to
        # preserve f32 accuracy.)
        n1_col = jnp.sum(sq1, axis=1, keepdims=True)
        scale = inv_t / jnp.maximum(n1_col, eps)
        lhs_ref[...] = (x1j_f32 * scale).astype(lhs_ref.dtype)

        # Lane-oriented (1, Tj) column statistics via a ones-row matmul
        # (avoids a (Tj, 1) -> (1, Tj) relayout; runs once per column block).
        ones_c = jnp.ones((1, x1j.shape[1]), jnp.float32)
        dims = (((1,), (1,)), ((), ()))
        n1 = jax.lax.dot_general(ones_c, sq1, dims,
                                 preferred_element_type=jnp.float32)
        n2 = jax.lax.dot_general(ones_c, sq2, dims,
                                 preferred_element_type=jnp.float32)
        pd = jax.lax.dot_general(ones_c, pr12, dims,
                                 preferred_element_type=jnp.float32)
        norm12 = jnp.sqrt(n1) * jnp.sqrt(n2)
        pdiag_ref[...] = pd * (inv_t / jnp.maximum(norm12, eps))   # p_sim / T

        m_acc[...] = jnp.full(m_acc.shape, -jnp.inf, dtype=jnp.float32)
        l_acc[...] = jnp.zeros(l_acc.shape, dtype=jnp.float32)

    # ---- Streamed step: z[r, c] = (x1_row_r . x1_col_c) / (T * ||x1_c||^2) --
    z = jax.lax.dot_general(x1i_ref[...], lhs_ref[...],
                            (((1,), (1,)), ((), ())),
                            preferred_element_type=jnp.float32)     # [Ti, Tj]

    def accumulate(zz):
        # Online logsumexp over the streamed row axis; accumulators are
        # lane-dense (1, Tj).
        m_prev = m_acc[...]
        m_new = jnp.maximum(m_prev, jnp.max(zz, axis=0, keepdims=True))
        l_acc[...] = (l_acc[...] * jnp.exp(m_prev - m_new)
                      + jnp.sum(jnp.exp(zz - m_new), axis=0, keepdims=True))
        m_acc[...] = m_new

    # The global diagonal intersects this [Ti, Tj] block only when the row and
    # column index ranges overlap; off-diagonal steps skip the mask entirely.
    row0 = i * ti
    col0 = j * tj
    on_diag = jnp.logical_and(row0 < col0 + tj, col0 < row0 + ti)

    @pl.when(on_diag)
    def _diag_step():
        grow = jax.lax.broadcasted_iota(jnp.int32, (ti, tj), 0) + row0
        gcol = jax.lax.broadcasted_iota(jnp.int32, (ti, tj), 1) + col0
        accumulate(jnp.where(grow == gcol, pdiag_ref[...], z))

    @pl.when(jnp.logical_not(on_diag))
    def _offdiag_step():
        accumulate(z)

    # ---- Finalize: per-column loss = logsumexp - p_sim / T (lane-dense). ----
    @pl.when(i == num_i - 1)
    def _finalize():
        out_ref[...] = (m_acc[...] + jnp.log(l_acc[...])
                        - pdiag_ref[...]).astype(out_ref.dtype)


def _vmem_limit_bytes():
    """Per-generation scoped-VMEM limit (with headroom for compiler scratch)."""
    try:
        cap = int(getattr(pltpu.get_tpu_info(), "vmem_capacity_bytes", 0))
    except Exception:
        cap = 0
    if cap <= 0:
        cap = 64 * 1024 * 1024      # conservative default (v7x-sized VMEM)
    return (cap * 3) // 4           # ~48 MiB on v7x, ~96 MiB on v5e/v6e


def _pick_tiles(n, c, itemsize, budget_bytes):
    """Pick (Tj resident column tile, Ti streamed row tile)."""
    # Tj: multiple of 128 dividing N (MXU-/lane-friendly, lane-dense output);
    # prefer >= 2 column blocks so the "parallel" axis can be megacore-split.
    tj = None
    for cand in (256, 128):
        if n % cand == 0 and n // cand >= 2:
            tj = cand
            break
    if tj is None:
        for cand in (256, 128):
            if n % cand == 0:
                tj = cand
                break
    if tj is None:
        tj = n  # small / odd N: single column block covering the whole axis

    def fits(ti_):
        # Double-buffered streamed (Ti, C) block + (double-buffered) resident
        # column blocks + lhs scratch + ~4 f32 [Ti, Tj] temporaries (z, exp...).
        inputs = (2 * ti_ + 5 * tj) * c * itemsize
        temps = 4 * ti_ * tj * 4
        return inputs + temps <= budget_bytes

    ti_cands = [t for t in (1024, 512, 256, 128, 64, 32, 16, 8) if n % t == 0]
    if n <= 1024:
        ti_cands.insert(0, n)       # whole row axis in one block when small
    ti = None
    for cand in ti_cands:           # largest first: fewer, denser grid steps
        if fits(cand):
            ti = cand
            break
    if ti is None:
        ti = ti_cands[-1] if ti_cands else n
    return tj, ti


@functools.partial(jax.jit, static_argnames=("temperature",))
def infonce_loss(input1, input2, temperature=0.999):
    """input1, input2: [N, C] arrays.  Returns the scalar InfoNCE loss."""
    n, c = input1.shape
    vmem_limit = _vmem_limit_bytes()
    tj, ti = _pick_tiles(n, c, input1.dtype.itemsize, (vmem_limit * 3) // 4)
    num_j = n // tj
    num_i = n // ti

    kernel = functools.partial(_infonce_kernel,
                               inv_t=float(1.0 / temperature),
                               eps=float(1e-8))

    per_col = pl.pallas_call(
        kernel,
        out_shape=jax.ShapeDtypeStruct((1, n), jnp.float32),
        grid_spec=pltpu.PrefetchScalarGridSpec(
            num_scalar_prefetch=0,
            grid=(num_j, num_i),
            in_specs=[
                pl.BlockSpec((ti, c), lambda j, i: (i, 0)),  # streamed x1 rows
                pl.BlockSpec((tj, c), lambda j, i: (j, 0)),  # resident x1 cols
                pl.BlockSpec((tj, c), lambda j, i: (j, 0)),  # resident x2 cols
            ],
            out_specs=pl.BlockSpec((1, tj), lambda j, i: (0, j)),
            scratch_shapes=[
                pltpu.VMEM((tj, c), input1.dtype),   # scaled x1 column block
                pltpu.VMEM((1, tj), jnp.float32),    # p_sim / T (lane form)
                pltpu.VMEM((1, tj), jnp.float32),    # running max
                pltpu.VMEM((1, tj), jnp.float32),    # running sum-exp
            ],
        ),
        compiler_params=pltpu.CompilerParams(
            dimension_semantics=("parallel", "arbitrary"),
            vmem_limit_bytes=vmem_limit,
        ),
    )(input1, input1, input2)

    return jnp.mean(per_col)


def _infonce_ref(input1, input2, temperature=0.999):
    # Pure-JAX reference mirroring the PyTorch module exactly.
    x1 = input1.astype(jnp.float32)
    x2 = input2.astype(jnp.float32)
    norm1 = jnp.linalg.norm(x1, axis=1)
    norm2 = jnp.linalg.norm(x2, axis=1)
    eps = jnp.float32(1e-8)
    norm = 1.0 / jnp.maximum(norm1 * norm2, eps)
    norm_n = 1.0 / jnp.maximum(norm1 * norm1, eps)
    p_sim = jnp.diag((x1 @ x2.T) * norm[None, :])
    m_sim = (x1 @ x1.T) * norm_n[None, :]
    n_mat = m_sim - jnp.diag(jnp.diag(m_sim)) + jnp.diag(p_sim)
    total = jnp.exp(n_mat / temperature).sum(axis=0)
    return (-jnp.log(jnp.exp(p_sim / temperature) / total)).mean()


if __name__ == "__main__":
    key = jax.random.PRNGKey(0)
    k1, k2, k3, k4 = jax.random.split(key, 4)

    # Small shape matching the module's [N, C] convention (single-block path).
    N, C = 8, 32
    x1 = jax.random.normal(k1, (N, C), dtype=jnp.float32)
    x2 = jax.random.normal(k2, (N, C), dtype=jnp.float32)
    loss = infonce_loss(x1, x2, temperature=0.999)
    jax.block_until_ready(loss)
    ref = _infonce_ref(x1, x2, temperature=0.999)
    assert jnp.allclose(loss, ref, rtol=1e-4, atol=1e-5), (loss, ref)

    # Larger shape exercising the tiled path: multiple column blocks, multiple
    # streamed row blocks with Ti != Tj (overlap-gated diagonal replacement)
    # and the online logsumexp across row blocks.
    N2, C2 = 2048, 64
    y1 = jax.random.normal(k3, (N2, C2), dtype=jnp.float32)
    y2 = jax.random.normal(k4, (N2, C2), dtype=jnp.float32)
    loss2 = infonce_loss(y1, y2, temperature=0.999)
    jax.block_until_ready(loss2)
    ref2 = _infonce_ref(y1, y2, temperature=0.999)
    assert jnp.allclose(loss2, ref2, rtol=1e-4, atol=1e-4), (loss2, ref2)

    print("KERNEL_OK")
</pallas_src>

<mosaic_0001>
module attributes {stable_mosaic.version = 11 : i64} {
  func.func @_infonce_kernel(%arg0: i32, %arg1: i32, %arg2: memref<8x32xf32, #tpu.memory_space<vmem>>, %arg3: memref<8x32xf32, #tpu.memory_space<vmem>>, %arg4: memref<8x32xf32, #tpu.memory_space<vmem>>, %arg5: memref<1x8xf32, #tpu.memory_space<vmem>>, %arg6: memref<8x32xf32, #tpu.memory_space<vmem>>, %arg7: memref<1x8xf32, #tpu.memory_space<vmem>>, %arg8: memref<1x8xf32, #tpu.memory_space<vmem>>, %arg9: memref<1x8xf32, #tpu.memory_space<vmem>>) attributes {dimension_semantics = [#tpu.dimension_semantics<parallel>, #tpu.dimension_semantics<arbitrary>], iteration_bounds = array<i64: 1, 1>, scalar_prefetch = 0 : i64, scratch_operands = 4 : i64, tpu.core_type = #tpu.core_type<tc>, window_params = [{transform_indices = @transform_0, window_bounds = array<i64: 8, 32>}, {transform_indices = @transform_1, window_bounds = array<i64: 8, 32>}, {transform_indices = @transform_2, window_bounds = array<i64: 8, 32>}, {transform_indices = @transform_3, window_bounds = array<i64: 1, 8>}]} {
    %c0_i32 = arith.constant 0 : i32
    %0 = arith.cmpi eq, %arg1, %c0_i32 : i32
    %1 = arith.extui %0 : i1 to i32
    %c0_i32_0 = arith.constant 0 : i32
    %2 = arith.cmpi ne, %1, %c0_i32_0 : i32
    scf.if %2 {
      %c0_11 = arith.constant 0 : index
      %c0_12 = arith.constant 0 : index
      %21 = vector.load %arg3[%c0_11, %c0_12] : memref<8x32xf32, #tpu.memory_space<vmem>>, vector<8x32xf32>
      %c0_13 = arith.constant 0 : index
      %c0_14 = arith.constant 0 : index
      %22 = vector.load %arg4[%c0_13, %c0_14] : memref<8x32xf32, #tpu.memory_space<vmem>>, vector<8x32xf32>
      %23 = arith.mulf %21, %21 : vector<8x32xf32>
      %24 = arith.mulf %22, %22 : vector<8x32xf32>
      %25 = arith.mulf %21, %22 : vector<8x32xf32>
      %cst_15 = arith.constant dense<0.000000e+00> : vector<8xf32>
      %26 = vector.multi_reduction <add>, %23, %cst_15 [1] : vector<8x32xf32> to vector<8xf32>
      %27 = vector.shape_cast %26 : vector<8xf32> to vector<8x1xf32>
      %cst_16 = arith.constant 9.99999993E-9 : f32
      %28 = vector.broadcast %cst_16 : f32 to vector<8x1xf32>
      %29 = arith.maximumf %27, %28 : vector<8x1xf32>
      %cst_17 = arith.constant 1.001001 : f32
      %30 = vector.broadcast %cst_17 : f32 to vector<8x1xf32>
      %31 = arith.divf %30, %29 : vector<8x1xf32>
      %32 = vector.broadcast %31 : vector<8x1xf32> to vector<8x32xf32>
      %33 = arith.mulf %21, %32 : vector<8x32xf32>
      %c0_18 = arith.constant 0 : index
      %c0_19 = arith.constant 0 : index
      %34 = vector.load %arg6[%c0_18, %c0_19] : memref<8x32xf32, #tpu.memory_space<vmem>>, vector<8x32xf32>
      tpu.vector_store %arg6[%c0_18, %c0_19], %33 {strides = array<i32>} : memref<8x32xf32, #tpu.memory_space<vmem>>, vector<8x32xf32>,
      %cst_20 = arith.constant 1.000000e+00 : f32
      %35 = vector.broadcast %cst_20 : f32 to vector<1x32xf32>
      %cst_21 = arith.constant dense<0.000000e+00> : vector<1x8xf32>
      %36 = tpu.matmul %35, %23, %cst_21 {dimension_numbers = #tpu.dot_dimension_numbers<[1], [1], [0], [0], [0, 0, 1, 0], [], []>} : vector<1x32xf32>, vector<8x32xf32>, vector<1x8xf32> -> vector<1x8xf32>
      %cst_22 = arith.constant dense<0.000000e+00> : vector<1x8xf32>
      %37 = tpu.matmul %35, %24, %cst_22 {dimension_numbers = #tpu.dot_dimension_numbers<[1], [1], [0], [0], [0, 0, 1, 0], [], []>} : vector<1x32xf32>, vector<8x32xf32>, vector<1x8xf32> -> vector<1x8xf32>
      %cst_23 = arith.constant dense<0.000000e+00> : vector<1x8xf32>
      %38 = tpu.matmul %35, %25, %cst_23 {dimension_numbers = #tpu.dot_dimension_numbers<[1], [1], [0], [0], [0, 0, 1, 0], [], []>} : vector<1x32xf32>, vector<8x32xf32>, vector<1x8xf32> -> vector<1x8xf32>
      %39 = math.sqrt %36 : vector<1x8xf32>
      %40 = math.sqrt %37 : vector<1x8xf32>
      %41 = arith.mulf %39, %40 : vector<1x8xf32>
      %cst_24 = arith.constant 9.99999993E-9 : f32
      %42 = vector.broadcast %cst_24 : f32 to vector<1x8xf32>
      %43 = arith.maximumf %41, %42 : vector<1x8xf32>
      %cst_25 = arith.constant 1.001001 : f32
      %44 = vector.broadcast %cst_25 : f32 to vector<1x8xf32>
      %45 = arith.divf %44, %43 : vector<1x8xf32>
      %46 = arith.mulf %38, %45 : vector<1x8xf32>
      %c0_26 = arith.constant 0 : index
      %c0_27 = arith.constant 0 : index
      %47 = vector.load %arg7[%c0_26, %c0_27] : memref<1x8xf32, #tpu.memory_space<vmem>>, vector<1x8xf32>
      tpu.vector_store %arg7[%c0_26, %c0_27], %46 {strides = array<i32>} : memref<1x8xf32, #tpu.memory_space<vmem>>, vector<1x8xf32>,
      %cst_28 = arith.constant 0xFF800000 : f32
      %48 = vector.broadcast %cst_28 : f32 to vector<1x8xf32>
      %c0_29 = arith.constant 0 : index
      %c0_30 = arith.constant 0 : index
      %49 = vector.load %arg8[%c0_29, %c0_30] : memref<1x8xf32, #tpu.memory_space<vmem>>, vector<1x8xf32>
      tpu.vector_store %arg8[%c0_29, %c0_30], %48 {strides = array<i32>} : memref<1x8xf32, #tpu.memory_space<vmem>>, vector<1x8xf32>,
      %cst_31 = arith.constant 0.000000e+00 : f32
      %50 = vector.broadcast %cst_31 : f32 to vector<1x8xf32>
      %c0_32 = arith.constant 0 : index
      %c0_33 = arith.constant 0 : index
      %51 = vector.load %arg9[%c0_32, %c0_33] : memref<1x8xf32, #tpu.memory_space<vmem>>, vector<1x8xf32>
      tpu.vector_store %arg9[%c0_32, %c0_33], %50 {strides = array<i32>} : memref<1x8xf32, #tpu.memory_space<vmem>>, vector<1x8xf32>,
    } else {
    }
    %c0 = arith.constant 0 : index
    %c0_1 = arith.constant 0 : index
    %3 = vector.load %arg2[%c0, %c0_1] : memref<8x32xf32, #tpu.memory_space<vmem>>, vector<8x32xf32>
    %c0_2 = arith.constant 0 : index
    %c0_3 = arith.constant 0 : index
    %4 = vector.load %arg6[%c0_2, %c0_3] : memref<8x32xf32, #tpu.memory_space<vmem>>, vector<8x32xf32>
    %cst = arith.constant dense<0.000000e+00> : vector<8x8xf32>
    %5 = tpu.matmul %3, %4, %cst {dimension_numbers = #tpu.dot_dimension_numbers<[1], [1], [0], [0], [0, 0, 1, 0], [], []>} : vector<8x32xf32>, vector<8x32xf32>, vector<8x8xf32> -> vector<8x8xf32>
    %c8_i32 = arith.constant 8 : i32
    %6 = arith.muli %arg1, %c8_i32 : i32
    %c8_i32_4 = arith.constant 8 : i32
    %7 = arith.muli %arg0, %c8_i32_4 : i32
    %c8_i32_5 = arith.constant 8 : i32
    %8 = arith.addi %7, %c8_i32_5 : i32
    %9 = arith.cmpi slt, %6, %8 : i32
    %c8_i32_6 = arith.constant 8 : i32
    %10 = arith.addi %6, %c8_i32_6 : i32
    %11 = arith.cmpi slt, %7, %10 : i32
    %12 = arith.andi %9, %11 : i1
    %13 = arith.extui %12 : i1 to i32
    %c0_i32_7 = arith.constant 0 : i32
    %14 = arith.cmpi ne, %13, %c0_i32_7 : i32
    scf.if %14 {
      %21 = tpu.iota {dimensions = array<i32: 0>} : vector<8x8xi32>
      %22 = vector.broadcast %6 : i32 to vector<8x8xi32>
      %23 = arith.addi %21, %22 : vector<8x8xi32>
      %24 = tpu.iota {dimensions = array<i32: 1>} : vector<8x8xi32>
      %25 = vector.broadcast %7 : i32 to vector<8x8xi32>
      %26 = arith.addi %24, %25 : vector<8x8xi32>
      %27 = arith.cmpi eq, %23, %26 : vector<8x8xi32>
      %c0_11 = arith.constant 0 : index
      %c0_12 = arith.constant 0 : index
      %28 = vector.load %arg7[%c0_11, %c0_12] : memref<1x8xf32, #tpu.memory_space<vmem>>, vector<1x8xf32>
      %29 = vector.shape_cast %28 : vector<1x8xf32> to vector<1x8xf32>
      %30 = vector.broadcast %29 : vector<1x8xf32> to vector<8x8xf32>
      %31 = arith.select %27, %30, %5 : vector<8x8xi1>, vector<8x8xf32>
      %c0_13 = arith.constant 0 : index
      %c0_14 = arith.constant 0 : index
      %32 = vector.load %arg8[%c0_13, %c0_14] : memref<1x8xf32, #tpu.memory_space<vmem>>, vector<1x8xf32>
      %cst_15 = arith.constant dense<0xFF800000> : vector<8xf32>
      %33 = vector.multi_reduction <maximumf>, %31, %cst_15 [0] : vector<8x8xf32> to vector<8xf32>
      %34 = vector.shape_cast %33 : vector<8xf32> to vector<1x8xf32>
      %35 = arith.maximumf %32, %34 : vector<1x8xf32>
      %c0_16 = arith.constant 0 : index
      %c0_17 = arith.constant 0 : index
      %36 = vector.load %arg9[%c0_16, %c0_17] : memref<1x8xf32, #tpu.memory_space<vmem>>, vector<1x8xf32>
      %37 = arith.subf %32, %35 : vector<1x8xf32>
      %38 = math.exp %37 : vector<1x8xf32>
      %39 = arith.mulf %36, %38 : vector<1x8xf32>
      %40 = vector.broadcast %35 : vector<1x8xf32> to vector<8x8xf32>
      %41 = arith.subf %31, %40 : vector<8x8xf32>
      %42 = math.exp %41 : vector<8x8xf32>
      %cst_18 = arith.constant dense<0.000000e+00> : vector<8xf32>
      %43 = vector.multi_reduction <add>, %42, %cst_18 [0] : vector<8x8xf32> to vector<8xf32>
      %44 = vector.shape_cast %43 : vector<8xf32> to vector<1x8xf32>
      %45 = arith.addf %39, %44 : vector<1x8xf32>
      %c0_19 = arith.constant 0 : index
      %c0_20 = arith.constant 0 : index
      %46 = vector.load %arg9[%c0_19, %c0_20] : memref<1x8xf32, #tpu.memory_space<vmem>>, vector<1x8xf32>
      tpu.vector_store %arg9[%c0_19, %c0_20], %45 {strides = array<i32>} : memref<1x8xf32, #tpu.memory_space<vmem>>, vector<1x8xf32>,
      %c0_21 = arith.constant 0 : index
      %c0_22 = arith.constant 0 : index
      %47 = vector.load %arg8[%c0_21, %c0_22] : memref<1x8xf32, #tpu.memory_space<vmem>>, vector<1x8xf32>
      tpu.vector_store %arg8[%c0_21, %c0_22], %35 {strides = array<i32>} : memref<1x8xf32, #tpu.memory_space<vmem>>, vector<1x8xf32>,
    } else {
    }
    %true = arith.constant true
    %15 = arith.xori %12, %true : i1
    %16 = arith.extui %15 : i1 to i32
    %c0_i32_8 = arith.constant 0 : i32
    %17 = arith.cmpi ne, %16, %c0_i32_8 : i32
    scf.if %17 {
      %c0_11 = arith.constant 0 : index
      %c0_12 = arith.constant 0 : index
      %21 = vector.load %arg8[%c0_11, %c0_12] : memref<1x8xf32, #tpu.memory_space<vmem>>, vector<1x8xf32>
      %cst_13 = arith.constant dense<0xFF800000> : vector<8xf32>
      %22 = vector.multi_reduction <maximumf>, %5, %cst_13 [0] : vector<8x8xf32> to vector<8xf32>
      %23 = vector.shape_cast %22 : vector<8xf32> to vector<1x8xf32>
      %24 = arith.maximumf %21, %23 : vector<1x8xf32>
      %c0_14 = arith.constant 0 : index
      %c0_15 = arith.constant 0 : index
      %25 = vector.load %arg9[%c0_14, %c0_15] : memref<1x8xf32, #tpu.memory_space<vmem>>, vector<1x8xf32>
      %26 = arith.subf %21, %24 : vector<1x8xf32>
      %27 = math.exp %26 : vector<1x8xf32>
      %28 = arith.mulf %25, %27 : vector<1x8xf32>
      %29 = vector.broadcast %24 : vector<1x8xf32> to vector<8x8xf32>
      %30 = arith.subf %5, %29 : vector<8x8xf32>
      %31 = math.exp %30 : vector<8x8xf32>
      %cst_16 = arith.constant dense<0.000000e+00> : vector<8xf32>
      %32 = vector.multi_reduction <add>, %31, %cst_16 [0] : vector<8x8xf32> to vector<8xf32>
      %33 = vector.shape_cast %32 : vector<8xf32> to vector<1x8xf32>
      %34 = arith.addf %28, %33 : vector<1x8xf32>
      %c0_17 = arith.constant 0 : index
      %c0_18 = arith.constant 0 : index
      %35 = vector.load %arg9[%c0_17, %c0_18] : memref<1x8xf32, #tpu.memory_space<vmem>>, vector<1x8xf32>
      tpu.vector_store %arg9[%c0_17, %c0_18], %34 {strides = array<i32>} : memref<1x8xf32, #tpu.memory_space<vmem>>, vector<1x8xf32>,
      %c0_19 = arith.constant 0 : index
      %c0_20 = arith.constant 0 : index
      %36 = vector.load %arg8[%c0_19, %c0_20] : memref<1x8xf32, #tpu.memory_space<vmem>>, vector<1x8xf32>
      tpu.vector_store %arg8[%c0_19, %c0_20], %24 {strides = array<i32>} : memref<1x8xf32, #tpu.memory_space<vmem>>, vector<1x8xf32>,
    } else {
    }
    %c0_i32_9 = arith.constant 0 : i32
    %18 = arith.cmpi eq, %arg1, %c0_i32_9 : i32
    %19 = arith.extui %18 : i1 to i32
    %c0_i32_10 = arith.constant 0 : i32
    %20 = arith.cmpi ne, %19, %c0_i32_10 : i32
    scf.if %20 {
      %c0_11 = arith.constant 0 : index
      %c0_12 = arith.constant 0 : index
      %21 = vector.load %arg8[%c0_11, %c0_12] : memref<1x8xf32, #tpu.memory_space<vmem>>, vector<1x8xf32>
      %c0_13 = arith.constant 0 : index
      %c0_14 = arith.constant 0 : index
      %22 = vector.load %arg9[%c0_13, %c0_14] : memref<1x8xf32, #tpu.memory_space<vmem>>, vector<1x8xf32>
      %23 = math.log %22 : vector<1x8xf32>
      %24 = arith.addf %21, %23 : vector<1x8xf32>
      %c0_15 = arith.constant 0 : index
      %c0_16 = arith.constant 0 : index
      %25 = vector.load %arg7[%c0_15, %c0_16] : memref<1x8xf32, #tpu.memory_space<vmem>>, vector<1x8xf32>
      %26 = arith.subf %24, %25 : vector<1x8xf32>
      %c0_17 = arith.constant 0 : index
      %c0_18 = arith.constant 0 : index
      %27 = vector.load %arg5[%c0_17, %c0_18] : memref<1x8xf32, #tpu.memory_space<vmem>>, vector<1x8xf32>
      tpu.vector_store %arg5[%c0_17, %c0_18], %26 {strides = array<i32>} : memref<1x8xf32, #tpu.memory_space<vmem>>, vector<1x8xf32>,
    } else {
    }
    return
  }
  func.func @transform_0(%arg0: i32, %arg1: i32) -> (i32, i32) {
    %c0_i32 = arith.constant 0 : i32
    %c0_i32_0 = arith.constant 0 : i32
    return %arg1, %c0_i32 : i32, i32
  }
  func.func @transform_1(%arg0: i32, %arg1: i32) -> (i32, i32) {
    %c0_i32 = arith.constant 0 : i32
    %c0_i32_0 = arith.constant 0 : i32
    return %arg0, %c0_i32 : i32, i32
  }
  func.func @transform_2(%arg0: i32, %arg1: i32) -> (i32, i32) {
    %c0_i32 = arith.constant 0 : i32
    %c0_i32_0 = arith.constant 0 : i32
    return %arg0, %c0_i32 : i32, i32
  }
  func.func @transform_3(%arg0: i32, %arg1: i32) -> (i32, i32) {
    %c0_i32 = arith.constant 0 : i32
    %c0_i32_0 = arith.constant 0 : i32
    return %c0_i32, %arg0 : i32, i32
  }
}

</mosaic_0001>

<bundles_post_ra>
// kernel: infonce_loss.1
= control target key start
LH: loop header
LB: loop body
LE: loop exit
PB: predicated region body
PF: predicated region fallthrough
CT: control target
= control target key end

     0   :  { %8 = vsyncpa [#allocation7], 0  ;;  %s725_s0 = inlined_call_operand.hbm [shape: f32[8,32], index: 0, kind: input, shape index: {}, may-alias: {0,1}]   ;;  %s726_s1 = inlined_call_operand.hbm [shape: f32[8,32], index: 1, kind: input, shape index: {}, may-alias: {0,1}]   ;;  %s727_s2 = inlined_call_operand.hbm [shape: f32[8,32], index: 2, kind: input, shape index: {}]   ;;  %s728_s3 = inlined_call_operand.vmem [shape: f32[1,8], index: 3, kind: output, shape index: {}]  }
   0x1   :  { %9 = vsyncpa [#allocation9], 0  ;;  %s637_s12 = smov [#allocation8]   ;;  %s638_s14 = smov [#allocation6]  }
   0x2   :  { %s26_s13 = sshll.u32 %s637_s12, 4  ;;  %s16_s15 = sshll.u32 %s638_s14, 4  ;;  %s27_s13 = int_to_ptr.vmem [resolvable:$true] %s26_s13  ;;  %s17_s15 = int_to_ptr.vmem [resolvable:$true] %s16_s15 }
   0x3   :  { %s567_s18 = scalar_lea.hbm %s726_s1, 128 }
   0x4   :  { %p568_p0 = scmp.ne.s32.totalorder %s726_s1, %s567_s18  ;;  %p571_p1 = scmp.lt.u32.totalorder %s567_s18, %s726_s1 }
   0x6   :  { %p573_p2 = pnand %p571_p1, %p568_p0 }
   0x8   :  { %576 = shalt.err (!%p573_p2)
}
   0x9   :  { %s577_s23 = scalar_lea.vmem %s27_s13, 128  ;;  %p582_p4 = scmp.lt.s32.totalorder %s27_s13, %s27_s13 }
   0xa   :  { %p578_p3 = scmp.ne.s32.totalorder %s27_s13, %s577_s23  ;;  %p583_p5 = scmp.lt.s32.totalorder %s577_s23, %s577_s23 }
   0xc   :  { %p584_p6 = por %p583_p5, %p582_p4 }
   0xe   :  { %p585_p7 = pnand %p584_p6, %p578_p3 }
  0x10   :  { %588 = shalt.err (!%p585_p7)
}
  0x11   :  { %29 = dma.hbm_to_vmem [thread:$0]  %s726_s1, 128, %s27_s13, [#allocation9]  }
  0x12   :  { %s589_s28 = scalar_lea.hbm %s725_s0, 128 }
  0x13   :  { %p590_p8 = scmp.ne.s32.totalorder %s725_s0, %s589_s28  ;;  %p593_p9 = scmp.lt.u32.totalorder %s589_s28, %s725_s0 }
  0x15   :  { %p595_p10 = pnand %p593_p9, %p590_p8 }
  0x17   :  { %598 = shalt.err (!%p595_p10)
}
  0x18   :  { %s599_s6 = scalar_lea.vmem %s17_s15, 128  ;;  %p604_p12 = scmp.lt.s32.totalorder %s17_s15, %s17_s15 }
  0x19   :  { %p600_p11 = scmp.ne.s32.totalorder %s17_s15, %s599_s6  ;;  %p605_p13 = scmp.lt.s32.totalorder %s599_s6, %s599_s6 }
  0x1b   :  { %p606_p0 = por %p605_p13, %p604_p12 }
  0x1d   :  { %p607_p1 = pnand %p606_p0, %p600_p11 }
  0x1f   :  { %610 = shalt.err (!%p607_p1)
}
  0x20   :  { %19 = dma.hbm_to_vmem [thread:$0]  %s725_s0, 128, %s17_s15, [#allocation7]  }
  0x21   :  { %s639_s8 = smov [#allocation10]   ;;  %s611_s12 = scalar_lea.hbm %s727_s2, 128 }
  0x22   :  { %s36_s9 = sshll.u32 %s639_s8, 4  ;;  %p612_p2 = scmp.ne.s32.totalorder %s727_s2, %s611_s12  ;;  %s37_s9 = int_to_ptr.vmem [resolvable:$true] %s36_s9 }
  0x23   :  { %p615_p3 = scmp.lt.u32.totalorder %s611_s12, %s727_s2 }
  0x25   :  { %p617_p4 = pnand %p615_p3, %p612_p2 }
  0x27   :  { %620 = shalt.err (!%p617_p4)
}
  0x28   :  { %s621_s18 = scalar_lea.vmem %s37_s9, 128  ;;  %p626_p6 = scmp.lt.s32.totalorder %s37_s9, %s37_s9 }
  0x29   :  { %p622_p5 = scmp.ne.s32.totalorder %s37_s9, %s621_s18  ;;  %p627_p7 = scmp.lt.s32.totalorder %s621_s18, %s621_s18 }
  0x2b   :  { %p628_p8 = por %p627_p7, %p626_p6 }
  0x2d   :  { %p629_p9 = pnand %p628_p8, %p622_p5 }
  0x2f   :  { %632 = shalt.err (!%p629_p9)
}
  0x30   :  { %39 = dma.hbm_to_vmem [thread:$0]  %s727_s2, 128, %s37_s9, [#allocation9]  }
  0x31   :  { %633 = dma.done.wait [#allocation7], 128  }
  0x32   :  { %634 = vsyncadd [#allocation7], 4294967168 }
  0x33   :  { %635 = dma.done.wait [#allocation9], 256  }
  0x34   :  { %636 = vsyncadd [#allocation9], 4294967040  ;;  %v640_v0 = vmov 0.0   ;;  %vm641_vm0 = vmmov 0   ;;  %v53_v1 = vld [vmem:[#allocation8] sm:$0xff]  ;;  %vm58_vm1 = vcmask 261120   ;;  %v401_v37 = vlaneseq }
  0x35   :  { %526 = vmatprep.subr.mxu0 %v640_v0  ;;  %531 = vmatprep.subr.mxu1 %v640_v0  ;;  %v54_v2 = vld [vmem:[#allocation10] sm:$0xff]  ;;  %v55_v3 = vmul.f32 %v53_v1, %v53_v1  ;;  %v642_v7 = vmov 1.0   ;;  %vm308_vm2 = vcmask 57344   ;;  %v643_v8 = vmov -inf   ;;  %v312_v15 = vld [vmem:[#allocation6] sm:$0xff] }
  0x36   :  { %528 = vmatprep.mubr.msk.f32.mxu0 %vm641_vm0, %v640_v0  ;;  %533 = vmatprep.mubr.msk.f32.mxu1 %vm641_vm0, %v640_v0  ;;  %v56_v4 = vmul.f32 %v54_v2, %v54_v2  ;;  %v57_v6 = vmul.f32 %v54_v2, %v53_v1  ;;  %311 = vst.msk [vmem:[#allocation5] sm:$0x1] %vm308_vm2, %v640_v0  ;;  %310 = vst.msk [vmem:[#allocation4] sm:$0x1] %vm308_vm2, %v643_v8  ;;  %v402_v38 = vshrl.u32 %v401_v37, 7  ;;  %vm419_vm8 = vcmask 64512  }
  0x37   :  { %v59_v5 = vsel %vm58_vm1, %v55_v3, 0.0  ;;  %527 = vmatpush3.xpose.msk.msra.mxu0 %vm58_vm1, %v55_v3  ;;  %v406_v39 = vand.u32 127, %v401_v37 }
  0x38   :  { %532 = vmatpush3.xpose.msk.msra.mxu1 %vm58_vm1, %v56_v4  ;;  %60 = vadd.xlane.f32.xlu0 %v59_v5  ;;  %v436_v52 = vsub.s32 0, %v402_v38 }
  0x39   :  { %536 = vmatprep.subr.mxu0 %v640_v0  ;;  %541 = vmatprep.subr.mxu1 %v640_v0  ;;  %vm409_vm7 = vcmp.eq.s32.totalorder %v402_v38, %v406_v39 }
  0x3a   :  { %529 = vmatmul.mubr.msk.f32.vlgmr.msra.gmra.mrb[0].mxu0 %vm58_vm1, %v642_v7 }
  0x3b   :  { %534 = vmatmul.mubr.msk.f32.vlgmr.msra.gmra.mrb[0].mxu1 %vm58_vm1, %v642_v7  ;;  %537 = vmatpush3.xpose.msk.msra.mxu0 %vm58_vm1, %v57_v6 }
  0x3c   :  { %538 = vmatprep.mubr.msk.f32.mxu0 %vm641_vm0, %v640_v0  ;;  %543 = vmatprep.mubr.msk.f32.mxu1 %vm641_vm0, %v640_v0 }
  0x3d   :  { %v418_v50 = vld [vmem:[#allocation4] sm:$0x1]  ;;  %v428_v2 = vld [vmem:[#allocation5] sm:$0x1] }
  0x3e   :  { %539 = vmatmul.mubr.msk.f32.vlgmr.msra.gmra.mrb[2].mxu0 %vm58_vm1, %v642_v7 }
  0xc5   :  { %v61_v9 = vpop.xlane.xlu0 %60 }
  0xc6   :  { %v62_v10 = vmax.f32 %v61_v9, 1e-08 }
  0xc8   :  { %553 = vrcp.f32 %v62_v10 }
  0xd2   :  { %v554_v11 = vpop.eup %553 }
  0xd3   :  { %v64_v12 = vmul.f32 1.001001, %v554_v11 }
  0xd5   :  { %v65_v13 = vmul.f32 %v64_v12, %v53_v1 }
  0xd7   :  { %66 = vst.msk [vmem:[#allocation2] sm:$0xff] %vm58_vm1, %v65_v13 }
  0xde   :  { %v313_v14 = vld [vmem:[#allocation2] sm:$0xff] }
  0xdf   :  { %542 = vmatpush3.xpose.msk.msra.mxu1 %vm58_vm1, %v313_v14 }
  0xe2   :  { %544 = vmatmul.mubr.msk.f32.vlgmr.msra.gmra.mrb[2].mxu1 %vm58_vm1, %v312_v15 }
 0x10d   :  { %v139_v16 = vpop.f32.mrb[0].mxu0 }
 0x10e   :  { %v212_v17 = vpop.f32.mrb[0].mxu1  ;;  %555 = vrsqrt.f32 %v139_v16  ;;  %v530_v18 = vpop.f32.mrb[1].mxu0  ;;  %vm291_vm3 = vcmp.eq.f32.partialorder %v139_v16, inf  ;;  %v294_v23 = vand.u32 2147483648, %v139_v16  ;;  %vm293_vm4 = vcmp.eq.f32.partialorder %v139_v16, 0.0 }
 0x10f   :  { %v535_v19 = vpop.f32.mrb[1].mxu1  ;;  %557 = vrsqrt.f32 %v212_v17  ;;  %vm298_vm5 = vcmp.eq.f32.partialorder %v212_v17, inf  ;;  %v301_v26 = vand.u32 2147483648, %v212_v17  ;;  %vm300_vm6 = vcmp.eq.f32.partialorder %v212_v17, 0.0 }
 0x111   :  { %v285_v20 = vpop.f32.mrb[2].mxu0 }
 0x112   :  { %v540_v21 = vpop.f32.mrb[3].mxu0 }
 0x118   :  { %v556_v22 = vpop.eup %555 }
 0x119   :  { %v558_v24 = vpop.eup %557  ;;  %v290_v25 = vmul.f32 %v556_v22, %v139_v16 }
 0x11a   :  { %v297_v27 = vmul.f32 %v558_v24, %v212_v17 }
 0x11b   :  { %v292_v28 = vsel %vm291_vm3, %v139_v16, %v290_v25 }
 0x11c   :  { %v295_v29 = vsel %vm293_vm4, %v294_v23, %v292_v28  ;;  %v299_v30 = vsel %vm298_vm5, %v212_v17, %v297_v27 }
 0x11d   :  { %v302_v31 = vsel %vm300_vm6, %v301_v26, %v299_v30 }
 0x11e   :  { %v303_v32 = vmul.f32 %v302_v31, %v295_v29 }
 0x120   :  { %v304_v33 = vmax.f32 %v303_v32, 1e-08 }
 0x122   :  { %559 = vrcp.f32 %v304_v33 }
 0x12c   :  { %v560_v34 = vpop.eup %559 }
 0x12d   :  { %v306_v35 = vmul.f32 1.001001, %v560_v34 }
 0x12f   :  { %v307_v36 = vmul.f32 %v306_v35, %v285_v20 }
 0x131   :  { %309 = vst.msk [vmem:[#allocation3] sm:$0x1] %vm308_vm2, %v307_v36 }
 0x138   :  { %v517_v41 = vld [vmem:[#allocation3] ss:$0 sm:$0xff] }
 0x139   :  { %v499_v12 = vld [vmem:[#allocation3] sm:$0x1] }
 0x1b5   :  { %v387_v40 = vpop.f32.mrb[2].mxu1 }
 0x1b6   :  { %v417_v42 = vsel %vm409_vm7, %v517_v41, %v387_v40  ;;  %v545_v43 = vpop.f32.mrb[3].mxu1 }
 0x1b7   :  { %v420_v44 = vsel %vm419_vm8, %v417_v42, -inf }
 0x1b8   :  { %v421_v45 = vrot.slane %v420_v44, 4 }
 0x1ba   :  { %v422_v46 = vmax.f32 %v420_v44, %v421_v45 }
 0x1bc   :  { %v423_v47 = vrot.slane %v422_v46, 2 }
 0x1be   :  { %v424_v48 = vmax.f32 %v422_v46, %v423_v47 }
 0x1c0   :  { %v425_v49 = vrot.slane %v424_v48, 1 }
 0x1c2   :  { %v426_v51 = vmax.f32 %v424_v48, %v425_v49 }
 0x1c4   :  { %v427_v53 = vmax.f32 %v418_v50, %v426_v51 }
 0x1c6   :  { %v437_v54 = vrot.slane %v427_v53, %v436_v52  ;;  %452 = vst.msk [vmem:[#allocation4] sm:$0x1] %vm308_vm2, %v427_v53  ;;  %v429_v57 = vsub.f32 %v418_v50, %v427_v53 }
 0x1c8   :  { %v439_v55 = vsub.f32 %v417_v42, %v437_v54  ;;  %v430_v58 = vmul.f32 1.442695, %v429_v57 }
 0x1ca   :  { %v440_v56 = vmul.f32 1.442695, %v439_v55 }
 0x1cc   :  { %561 = vpow2.f32 %v440_v56 }
 0x1cd   :  { %563 = vpow2.f32 %v430_v58  ;;  %v494_v10 = vld [vmem:[#allocation4] sm:$0x1] }
 0x1d6   :  { %v562_v59 = vpop.eup %561 }
 0x1d7   :  { %v442_v60 = vsel %vm419_vm8, %v562_v59, 0.0  ;;  %v564_v1 = vpop.eup %563 }
 0x1d8   :  { %v443_v61 = vrot.slane %v442_v60, 4  ;;  %v432_v4 = vmul.f32 %v564_v1, %v428_v2 }
 0x1da   :  { %v444_v62 = vadd.f32 %v443_v61, %v442_v60 }
 0x1dc   :  { %v445_v63 = vrot.slane %v444_v62, 2 }
 0x1de   :  { %v446_v0 = vadd.f32 %v445_v63, %v444_v62 }
 0x1e0   :  { %v447_v3 = vrot.slane %v446_v0, 1 }
 0x1e2   :  { %v448_v5 = vadd.f32 %v447_v3, %v446_v0 }
 0x1e4   :  { %v449_v6 = vadd.f32 %v448_v5, %v432_v4 }
 0x1e6   :  { %451 = vst.msk [vmem:[#allocation5] sm:$0x1] %vm308_vm2, %v449_v6 }
 0x1ed   :  { %v495_v7 = vld [vmem:[#allocation5] sm:$0x1] }
 0x1ee   :  { %565 = vlog2.f32 %v495_v7 }
 0x1f8   :  { %v566_v8 = vpop.eup %565 }
 0x1f9   :  { %v497_v9 = vmul.f32 0.6931472, %v566_v8 }
 0x1fb   :  { %v498_v11 = vadd.f32 %v497_v9, %v494_v10 }
 0x1fd   :  { %v500_v13 = vsub.f32 %v498_v11, %v499_v12 }
 0x1ff   :  { %502 = vst.msk [vmem:[%s728_s3] sm:$0x1] %vm308_vm2, %v500_v13 }
 0x200   :  { %507 = vsyncpa [#allocation7], 1 }
 0x201   :  { %508 = vsyncpa [#allocation9], 1 }

</bundles_post_ra>
